<compile_context>
chip_gen: v6e
topology: v6e:2x2x1
jax: 0.10.0
libtpu: 0.0.40
codegen_flags: <defaults>
</compile_context>

<pallas_src>
import jax
import jax.numpy as jnp
from jax.experimental import pallas as pl
from jax.experimental.pallas import tpu as pltpu

FEATURE_NUM = 44
HIDDEN1 = 100
HIDDEN2 = 50
ACTION_NUM = 4

# lane-friendly padded hidden widths (zero padding is exact)
H1_PAD = 128
H2_PAD = 128

CHUNK_ROWS = 512  # rows per in-kernel chunk (bounds live f32 intermediates)


def _round_up(n, m):
    return ((n + m - 1) // m) * m


def _device_tile_rows():
    """Generation-aware default rows-per-grid-step."""
    try:
        kind = jax.devices()[0].device_kind.lower()
    except Exception:
        return 8192
    if "v5 lite" in kind or "v5e" in kind:
        return 8192          # lowest HBM BW; ~5-6 MiB of tile VMEM is plenty
    if "v7" in kind or "7x" in kind:
        return 8192          # 64 MiB VMEM/TC; rely on >=2-step grid for megacore
    return 16384             # v6e-class and other large-VMEM parts


def _make_kernel(n_chunks):
    def mlp_kernel(x_ref, w1_ref, b1_ref, w2_ref, b2_ref, w3t_ref, b3t_ref, o_ref):
        w1 = w1_ref[...]
        b1 = b1_ref[...]
        w2 = w2_ref[...]
        b2 = b2_ref[...]
        w3t = w3t_ref[...]
        b3t = b3t_ref[...]

        def compute(c):
            x = x_ref[c]                                           # (chunk, 44)
            # Layer 1: Linear(44 -> 128 padded) + Tanh (f32 accumulate/activation)
            h1 = jnp.tanh(
                jnp.dot(x, w1, preferred_element_type=jnp.float32) + b1)
            # Layer 2: Linear(128 -> 128 padded) + ReLU
            h2 = jnp.maximum(
                jnp.dot(h1.astype(w2.dtype), w2,
                        preferred_element_type=jnp.float32) + b2, 0.0)
            # Layer 3: Linear(128 -> 4), emitted lane-dense as (ACTION_NUM, chunk):
            # contract w3^T (4, H2_PAD) with h2 (chunk, H2_PAD) on the hidden dim.
            y = jax.lax.dot_general(
                w3t, h2.astype(w3t.dtype),
                dimension_numbers=(((1,), (1,)), ((), ())),
                preferred_element_type=jnp.float32) + b3t
            o_ref[c] = y.astype(o_ref.dtype)

        if n_chunks == 1:
            compute(0)
        else:
            def body(c, carry):
                compute(c)
                return carry
            jax.lax.fori_loop(0, n_chunks, body, 0, unroll=True)

    return mlp_kernel


def mynet_forward(x, params, *, compute_dtype=jnp.bfloat16, tile_b=None):
    """x: (B, FEATURE_NUM) float32; params: dict of unpadded weights/biases.

    Returns (B, ACTION_NUM) float32 logits (matches MyNet.forward).
    """
    B = x.shape[0]
    assert B >= 1 and x.shape[1] == FEATURE_NUM

    # --- tile policy --------------------------------------------------------
    cap = tile_b if tile_b is not None else _device_tile_rows()
    chunk = min(CHUNK_ROWS, _round_up(B, 16))            # 16: bf16 sublane packing
    tb = max(chunk, min(_round_up(cap, chunk),            # big tile: amortize step cost
                        _round_up(pl.cdiv(B, 2), chunk)))  # but keep >=2 grid steps
    n_chunks = tb // chunk
    b_pad = _round_up(B, tb)
    grid = (b_pad // tb,)

    # --- one-time wrapper-side padding + dtype casts ------------------------
    def pad_to(a, shape):
        return jnp.pad(a, [(0, t - s) for s, t in zip(a.shape, shape)])

    w1 = pad_to(params["w1"], (FEATURE_NUM, H1_PAD)).astype(compute_dtype)
    b1 = pad_to(params["b1"], (1, H1_PAD)).astype(jnp.float32)
    w2 = pad_to(params["w2"], (H1_PAD, H2_PAD)).astype(compute_dtype)
    b2 = pad_to(params["b2"], (1, H2_PAD)).astype(jnp.float32)
    w3t = pad_to(params["w3"], (H2_PAD, ACTION_NUM)).T.astype(compute_dtype)  # (4, 128)
    b3t = params["b3"].reshape(1, ACTION_NUM).T.astype(jnp.float32)           # (4, 1)

    xc = x.astype(compute_dtype)
    if b_pad != B:
        xc = jnp.pad(xc, ((0, b_pad - B), (0, 0)))
    xc = xc.reshape(b_pad // chunk, chunk, FEATURE_NUM)   # free row-major reshape

    const = lambda a: pl.BlockSpec(a.shape, lambda i, _n=a.ndim: (0,) * _n)

    # --- honest (lane-padded) VMEM sizing -> explicit scoped-VMEM limit -----
    x_item = jnp.dtype(compute_dtype).itemsize
    vmem_est = (
        tb * (2 * 128 * x_item        # x blocks: 44 lanes pad to 128, double-buffered
              + 2 * 8 * 4)            # out blocks: 4 sublanes pad to 8, double-buffered
        + 2 * chunk * (H1_PAD + H2_PAD) * (4 + x_item)   # per-chunk temps (+ slack)
        + (512 << 10)                 # resident weights/biases + misc
    )
    vmem_limit = int(min(48 << 20, max(32 << 20, 2 * vmem_est)))   # v7x-safe cap

    flops = 2 * b_pad * (FEATURE_NUM * H1_PAD + H1_PAD * H2_PAD + H2_PAD * ACTION_NUM)
    bytes_accessed = (
        int(xc.size) * x_item
        + b_pad * ACTION_NUM * 4
        + sum(int(a.size) * a.dtype.itemsize for a in (w1, b1, w2, b2, w3t, b3t))
    )

    out = pl.pallas_call(
        _make_kernel(n_chunks),
        out_shape=jax.ShapeDtypeStruct((b_pad // chunk, ACTION_NUM, chunk), jnp.float32),
        grid=grid,
        in_specs=[
            pl.BlockSpec((n_chunks, chunk, FEATURE_NUM), lambda i: (i, 0, 0)),
            const(w1), const(b1),             # weights/biases stay VMEM-resident
            const(w2), const(b2),
            const(w3t), const(b3t),
        ],
        out_specs=pl.BlockSpec((n_chunks, ACTION_NUM, chunk), lambda i: (i, 0, 0)),
        compiler_params=pltpu.CompilerParams(
            dimension_semantics=("parallel",),        # megacore sharding on v7x
            vmem_limit_bytes=vmem_limit,
        ),
        cost_estimate=pl.CostEstimate(
            flops=flops,
            transcendentals=b_pad * H1_PAD,           # tanh
            bytes_accessed=bytes_accessed,
        ),
    )(xc, w1, b1, w2, b2, w3t, b3t)

    # (chunks, 4, chunk) -> (B, 4); this transpose only touches 16 B/row of HBM.
    return out.transpose(0, 2, 1).reshape(b_pad, ACTION_NUM)[:B]


def init_params(key):
    """Deterministic init mimicking PyTorch nn.Linear default U(-1/sqrt(fan_in), 1/sqrt(fan_in))."""
    def linear_init(k, fan_in, fan_out):
        kw, kb = jax.random.split(k)
        bound = 1.0 / jnp.sqrt(fan_in)
        w = jax.random.uniform(kw, (fan_in, fan_out), jnp.float32, -bound, bound)
        b = jax.random.uniform(kb, (1, fan_out), jnp.float32, -bound, bound)
        return w, b

    k1, k2, k3 = jax.random.split(key, 3)
    w1, b1 = linear_init(k1, FEATURE_NUM, HIDDEN1)
    w2, b2 = linear_init(k2, HIDDEN1, HIDDEN2)
    w3, b3 = linear_init(k3, HIDDEN2, ACTION_NUM)
    return {"w1": w1, "b1": b1, "w2": w2, "b2": b2, "w3": w3, "b3": b3}


def _ref_bf16(x, params, cd=jnp.bfloat16):
    """Reference matching the kernel's bf16-inputs / f32-accumulate path."""
    xr = x.astype(cd)
    h1 = jnp.tanh(jnp.dot(xr, params["w1"].astype(cd),
                          preferred_element_type=jnp.float32) + params["b1"])
    h2 = jnp.maximum(jnp.dot(h1.astype(cd), params["w2"].astype(cd),
                             preferred_element_type=jnp.float32) + params["b2"], 0.0)
    return jnp.dot(h2.astype(cd), params["w3"].astype(cd),
                   preferred_element_type=jnp.float32) + params["b3"]


def _ref_f32(x, params):
    """Pure-f32 reference (matches the PyTorch module's math)."""
    h1 = jnp.tanh(x @ params["w1"] + params["b1"])
    h2 = jnp.maximum(h1 @ params["w2"] + params["b2"], 0.0)
    return h2 @ params["w3"] + params["b3"]


if __name__ == "__main__":
    key = jax.random.PRNGKey(0)
    pkey, xkey, xkey2 = jax.random.split(key, 3)
    params = init_params(pkey)

    # Small-shape smoke test (single grid step, single chunk).
    B = 8
    x = jax.random.normal(xkey, (B, FEATURE_NUM), jnp.float32)
    out = jax.block_until_ready(mynet_forward(x, params))
    assert out.shape == (B, ACTION_NUM)
    assert jnp.allclose(out, _ref_bf16(x, params), atol=2e-3, rtol=2e-3)
    assert jnp.allclose(out, _ref_f32(x, params), atol=5e-2, rtol=5e-2)

    # Larger check exercising the multi-step grid + in-kernel chunk loop.
    B2 = 2048
    x2 = jax.random.normal(xkey2, (B2, FEATURE_NUM), jnp.float32)
    out2 = jax.block_until_ready(mynet_forward(x2, params))
    assert out2.shape == (B2, ACTION_NUM)
    assert jnp.allclose(out2, _ref_bf16(x2, params), atol=2e-3, rtol=2e-3)
    assert jnp.allclose(out2, _ref_f32(x2, params), atol=1e-1, rtol=1e-1)

    print("KERNEL_OK")
</pallas_src>

<mosaic_0001>
module attributes {stable_mosaic.version = 11 : i64} {
  func.func @mlp_kernel(%arg0: i32, %arg1: memref<1x16x44xbf16, #tpu.memory_space<vmem>>, %arg2: memref<44x128xbf16, #tpu.memory_space<vmem>>, %arg3: memref<1x128xf32, #tpu.memory_space<vmem>>, %arg4: memref<128x128xbf16, #tpu.memory_space<vmem>>, %arg5: memref<1x128xf32, #tpu.memory_space<vmem>>, %arg6: memref<4x128xbf16, #tpu.memory_space<vmem>>, %arg7: memref<4x1xf32, #tpu.memory_space<vmem>>, %arg8: memref<1x4x16xf32, #tpu.memory_space<vmem>>) attributes {dimension_semantics = [#tpu.dimension_semantics<parallel>], iteration_bounds = array<i64: 1>, scalar_prefetch = 0 : i64, scratch_operands = 0 : i64, tpu.core_type = #tpu.core_type<tc>, window_params = [{transform_indices = @transform_0, window_bounds = array<i64: 1, 16, 44>}, {pipeline_mode = #tpu.pipeline_mode<synchronous>, transform_indices = @transform_1, window_bounds = array<i64: 44, 128>}, {pipeline_mode = #tpu.pipeline_mode<synchronous>, transform_indices = @transform_2, window_bounds = array<i64: 1, 128>}, {pipeline_mode = #tpu.pipeline_mode<synchronous>, transform_indices = @transform_3, window_bounds = array<i64: 128, 128>}, {pipeline_mode = #tpu.pipeline_mode<synchronous>, transform_indices = @transform_4, window_bounds = array<i64: 1, 128>}, {pipeline_mode = #tpu.pipeline_mode<synchronous>, transform_indices = @transform_5, window_bounds = array<i64: 4, 128>}, {pipeline_mode = #tpu.pipeline_mode<synchronous>, transform_indices = @transform_6, window_bounds = array<i64: 4, 1>}, {transform_indices = @transform_7, window_bounds = array<i64: 1, 4, 16>}]} {
    %c0 = arith.constant 0 : index
    %c0_0 = arith.constant 0 : index
    %0 = vector.load %arg2[%c0, %c0_0] : memref<44x128xbf16, #tpu.memory_space<vmem>>, vector<44x128xbf16>
    %c0_1 = arith.constant 0 : index
    %c0_2 = arith.constant 0 : index
    %1 = vector.load %arg3[%c0_1, %c0_2] : memref<1x128xf32, #tpu.memory_space<vmem>>, vector<1x128xf32>
    %c0_3 = arith.constant 0 : index
    %c0_4 = arith.constant 0 : index
    %2 = vector.load %arg4[%c0_3, %c0_4] : memref<128x128xbf16, #tpu.memory_space<vmem>>, vector<128x128xbf16>
    %c0_5 = arith.constant 0 : index
    %c0_6 = arith.constant 0 : index
    %3 = vector.load %arg5[%c0_5, %c0_6] : memref<1x128xf32, #tpu.memory_space<vmem>>, vector<1x128xf32>
    %c0_7 = arith.constant 0 : index
    %c0_8 = arith.constant 0 : index
    %4 = vector.load %arg6[%c0_7, %c0_8] : memref<4x128xbf16, #tpu.memory_space<vmem>>, vector<4x128xbf16>
    %c0_9 = arith.constant 0 : index
    %c0_10 = arith.constant 0 : index
    %5 = vector.load %arg7[%c0_9, %c0_10] : memref<4x1xf32, #tpu.memory_space<vmem>>, vector<4x1xf32>
    %c0_11 = arith.constant 0 : index
    %c0_12 = arith.constant 0 : index
    %c0_13 = arith.constant 0 : index
    %6 = vector.load %arg1[%c0_11, %c0_12, %c0_13] : memref<1x16x44xbf16, #tpu.memory_space<vmem>>, vector<1x16x44xbf16>
    %7 = vector.shape_cast %6 : vector<1x16x44xbf16> to vector<16x44xbf16>
    %cst = arith.constant dense<0.000000e+00> : vector<16x128xf32>
    %8 = tpu.matmul %7, %0, %cst {dimension_numbers = #tpu.dot_dimension_numbers<[1], [0], [0], [1], [0, 0, 1, 1], [], []>} : vector<16x44xbf16>, vector<44x128xbf16>, vector<16x128xf32> -> vector<16x128xf32>
    %9 = vector.broadcast %1 : vector<1x128xf32> to vector<16x128xf32>
    %10 = arith.addf %8, %9 : vector<16x128xf32>
    %11 = math.tanh %10 : vector<16x128xf32>
    %12 = arith.truncf %11 : vector<16x128xf32> to vector<16x128xbf16>
    %cst_14 = arith.constant dense<0.000000e+00> : vector<16x128xf32>
    %13 = tpu.matmul %12, %2, %cst_14 {dimension_numbers = #tpu.dot_dimension_numbers<[1], [0], [0], [1], [0, 0, 1, 1], [], []>} : vector<16x128xbf16>, vector<128x128xbf16>, vector<16x128xf32> -> vector<16x128xf32>
    %14 = vector.broadcast %3 : vector<1x128xf32> to vector<16x128xf32>
    %15 = arith.addf %13, %14 : vector<16x128xf32>
    %cst_15 = arith.constant 0.000000e+00 : f32
    %16 = vector.broadcast %cst_15 : f32 to vector<16x128xf32>
    %17 = arith.maximumf %15, %16 : vector<16x128xf32>
    %18 = arith.truncf %17 : vector<16x128xf32> to vector<16x128xbf16>
    %cst_16 = arith.constant dense<0.000000e+00> : vector<4x16xf32>
    %19 = tpu.matmul %4, %18, %cst_16 {dimension_numbers = #tpu.dot_dimension_numbers<[1], [1], [0], [0], [0, 0, 1, 0], [], []>} : vector<4x128xbf16>, vector<16x128xbf16>, vector<4x16xf32> -> vector<4x16xf32>
    %20 = vector.broadcast %5 : vector<4x1xf32> to vector<4x16xf32>
    %21 = arith.addf %19, %20 : vector<4x16xf32>
    %c0_17 = arith.constant 0 : index
    %c0_18 = arith.constant 0 : index
    %c0_19 = arith.constant 0 : index
    %22 = vector.load %arg8[%c0_17, %c0_18, %c0_19] : memref<1x4x16xf32, #tpu.memory_space<vmem>>, vector<1x4x16xf32>
    %23 = vector.shape_cast %22 : vector<1x4x16xf32> to vector<4x16xf32>
    %24 = vector.shape_cast %21 : vector<4x16xf32> to vector<1x4x16xf32>
    tpu.vector_store %arg8[%c0_17, %c0_18, %c0_19], %24 {strides = array<i32>} : memref<1x4x16xf32, #tpu.memory_space<vmem>>, vector<1x4x16xf32>,
    return
  }
  func.func @transform_0(%arg0: i32) -> (i32, i32, i32) {
    %c0_i32 = arith.constant 0 : i32
    %c0_i32_0 = arith.constant 0 : i32
    %c0_i32_1 = arith.constant 0 : i32
    return %arg0, %c0_i32, %c0_i32_0 : i32, i32, i32
  }
  func.func @transform_1(%arg0: i32) -> (i32, i32) {
    %c0_i32 = arith.constant 0 : i32
    %c0_i32_0 = arith.constant 0 : i32
    %c0_i32_1 = arith.constant 0 : i32
    return %c0_i32, %c0_i32_0 : i32, i32
  }
  func.func @transform_2(%arg0: i32) -> (i32, i32) {
    %c0_i32 = arith.constant 0 : i32
    %c0_i32_0 = arith.constant 0 : i32
    %c0_i32_1 = arith.constant 0 : i32
    return %c0_i32, %c0_i32_0 : i32, i32
  }
  func.func @transform_3(%arg0: i32) -> (i32, i32) {
    %c0_i32 = arith.constant 0 : i32
    %c0_i32_0 = arith.constant 0 : i32
    %c0_i32_1 = arith.constant 0 : i32
    return %c0_i32, %c0_i32_0 : i32, i32
  }
  func.func @transform_4(%arg0: i32) -> (i32, i32) {
    %c0_i32 = arith.constant 0 : i32
    %c0_i32_0 = arith.constant 0 : i32
    %c0_i32_1 = arith.constant 0 : i32
    return %c0_i32, %c0_i32_0 : i32, i32
  }
  func.func @transform_5(%arg0: i32) -> (i32, i32) {
    %c0_i32 = arith.constant 0 : i32
    %c0_i32_0 = arith.constant 0 : i32
    %c0_i32_1 = arith.constant 0 : i32
    return %c0_i32, %c0_i32_0 : i32, i32
  }
  func.func @transform_6(%arg0: i32) -> (i32, i32) {
    %c0_i32 = arith.constant 0 : i32
    %c0_i32_0 = arith.constant 0 : i32
    %c0_i32_1 = arith.constant 0 : i32
    return %c0_i32, %c0_i32_0 : i32, i32
  }
  func.func @transform_7(%arg0: i32) -> (i32, i32, i32) {
    %c0_i32 = arith.constant 0 : i32
    %c0_i32_0 = arith.constant 0 : i32
    %c0_i32_1 = arith.constant 0 : i32
    return %arg0, %c0_i32, %c0_i32_0 : i32, i32, i32
  }
}

</mosaic_0001>

<bundles_post_ra>
// kernel: tpu_custom_call.1
= control target key start
LH: loop header
LB: loop body
LE: loop exit
PB: predicated region body
PF: predicated region fallthrough
CT: control target
= control target key end

     0   :  { %12 = vsyncpa [#allocation3], 0  ;;  %s592_s0 = inlined_call_operand.hbm [shape: bf16[1,16,44], index: 0, kind: input, shape index: {}]   ;;  %s593_s1 = inlined_call_operand.hbm [shape: bf16[44,128], index: 1, kind: input, shape index: {}]   ;;  %s594_s2 = inlined_call_operand.vmem [shape: f32[1,128], index: 2, kind: input, shape index: {}]   ;;  %s595_s3 = inlined_call_operand.hbm [shape: bf16[128,128], index: 3, kind: input, shape index: {}]   ;;  %s596_s4 = inlined_call_operand.vmem [shape: f32[1,128], index: 4, kind: input, shape index: {}]   ;;  %s597_s5 = inlined_call_operand.vmem [shape: bf16[4,128], index: 5, kind: input, shape index: {}]   ;;  %s598_s6 = inlined_call_operand.vmem [shape: f32[4,1], index: 6, kind: input, shape index: {}]   ;;  %s599_s7 = inlined_call_operand.hbm [shape: f32[1,4,16], index: 7, kind: output, shape index: {}]  }
   0x1   :  { %13 = vsyncpa [#allocation6], 0 }
   0x2   :  { %14 = vsyncpa [#allocation4], 0  ;;  %s516_s24 = smov [#allocation5]   ;;  %s517_s26 = smov [#allocation2]  }
   0x3   :  { %s32_s25 = sshll.u32 %s516_s24, 4  ;;  %s20_s27 = sshll.u32 %s517_s26, 4  ;;  %s33_s25 = int_to_ptr.vmem [resolvable:$true] %s32_s25  ;;  %s21_s27 = int_to_ptr.vmem [resolvable:$true] %s20_s27 }
   0x4   :  { %s438_s28 = scalar_lea.vmem %s33_s25, 384  ;;  %p443_p1 = scmp.lt.s32.totalorder %s33_s25, %s33_s25 }
   0x5   :  { %p439_p0 = scmp.ne.s32.totalorder %s33_s25, %s438_s28  ;;  %p444_p2 = scmp.lt.s32.totalorder %s438_s28, %s438_s28 }
   0x7   :  { %p445_p3 = por %p444_p2, %p443_p1 }
   0x9   :  { %p446_p4 = pnand %p445_p3, %p439_p0 }
   0xb   :  { %449 = shalt.err (!%p446_p4)
}
   0xc   :  { %s518_s29 = smov 64   ;;  %s519_s30 = smov 4  }
   0xd   :  { %38 = dma.hbm_to_vmem [thread:$0]  %s593_s1, 384, %s33_s25, [#allocation6], %s518_s29, %s518_s29, %s519_s30  }
   0xe   :  { %s458_s10 = scalar_lea.vmem %s21_s27, 128  ;;  %p463_p6 = scmp.lt.s32.totalorder %s21_s27, %s21_s27 }
   0xf   :  { %p459_p5 = scmp.ne.s32.totalorder %s21_s27, %s458_s10  ;;  %p464_p7 = scmp.lt.s32.totalorder %s458_s10, %s458_s10 }
  0x11   :  { %p465_p8 = por %p464_p7, %p463_p6 }
  0x13   :  { %p466_p9 = pnand %p465_p8, %p459_p5 }
  0x15   :  { %469 = shalt.err (!%p466_p9)
}
  0x16   :  { %26 = dma.hbm_to_vmem [thread:$0]  %s592_s0, 128, %s21_s27, [#allocation3], %s518_s29, %s518_s29, %s519_s30  }
  0x17   :  { %s520_s13 = smov [#allocation7]  }
  0x18   :  { %s46_s14 = sshll.u32 %s520_s13, 4  ;;  %s47_s14 = int_to_ptr.vmem [resolvable:$true] %s46_s14 }
  0x19   :  { %s478_s15 = scalar_lea.vmem %s47_s14, 1024  ;;  %p483_p11 = scmp.lt.s32.totalorder %s47_s14, %s47_s14 }
  0x1a   :  { %p479_p10 = scmp.ne.s32.totalorder %s47_s14, %s478_s15  ;;  %p484_p12 = scmp.lt.s32.totalorder %s478_s15, %s478_s15 }
  0x1c   :  { %p485_p13 = por %p484_p12, %p483_p11 }
  0x1e   :  { %p486_p0 = pnand %p485_p13, %p479_p10 }
  0x20   :  { %489 = shalt.err (!%p486_p0)
}
  0x21   :  { %52 = dma.hbm_to_vmem [thread:$0]  %s595_s3, 1024, %s47_s14, [#allocation6], %s518_s29, %s518_s29, %s519_s30  }
  0x22   :  { %510 = dma.done.wait [#allocation3], 128  }
  0x23   :  { %511 = vsyncadd [#allocation3], 4294967168 }
  0x24   :  { %512 = dma.done.wait [#allocation6], 1408  }
  0x25   :  { %513 = vsyncadd [#allocation6], 4294965888  ;;  %v521_v0 = vmov 0.0   ;;  %vm522_vm0 = vmmov 0   ;;  %vm129_vm1 = vcmask 1045504   ;;  %v415_v3 = vld [vmem:[#allocation5 + $0x8] sm:$0xff]  }
  0x26   :  { %368 = vmatprep.subr.bf16.mxu0 %v521_v0  ;;  %374 = vmatprep.mubr.msk.bf16.mxu0 %vm522_vm0, %v521_v0  ;;  %v414_v1 = vld [vmem:[#allocation5 + $0x10] sm:$0x3f]   ;;  %v416_v5 = vld [vmem:[#allocation5] sm:$0xff]   ;;  %v419_v6 = vld [vmem:[#allocation7 + $0x30] sm:$0xff]   ;;  %vm125_vm2 = vcmask 359424   ;;  %v523_v25 = vmov 0  }
  0x27   :  { %378 = vmatprep.subr.bf16.mxu1 %v521_v0  ;;  %394 = vmatprep.mubr.msk.bf16.mxu1 %vm522_vm0, %v521_v0  ;;  %v131_v2 = vsel %vm129_vm1, %v414_v1, 0  ;;  %v418_v4 = vld [vmem:[#allocation7 + $0x38] sm:$0xff]   ;;  %v417_v7 = vld [vmem:[#allocation2] sm:$0xff]   ;;  %v420_v8 = vld [vmem:[#allocation7 + $0x28] sm:$0xff]   ;;  %vm320_vm3 = vcmask 125952  }
  0x28   :  { %369 = vmatpush3.bf16.msra.mxu0 %v131_v2  ;;  %379 = vmatpush3.bf16.msra.mxu1 %v418_v4  ;;  %v421_v9 = vld [vmem:[#allocation7 + $0x20] sm:$0xff]   ;;  %v422_v10 = vld [vmem:[#allocation7 + $0x18] sm:$0xff]   ;;  %v423_v11 = vld [vmem:[#allocation7 + $0x10] sm:$0xff]  }
  0x29   :  { %370 = vmatprep.subr.bf16.mxu0 %v521_v0  ;;  %380 = vmatprep.subr.bf16.mxu1 %v521_v0  ;;  %v424_v12 = vld [vmem:[#allocation7 + $0x8] sm:$0xff]   ;;  %v425_v13 = vld [vmem:[#allocation7] sm:$0xff]  }
  0x2a   :  { %v338_v14 = vld [vmem:[%s594_s2] ss:$0 sm:$0xff]  ;;  %413 = vset.pattern.permute.xlu0 %v523_v25 }
  0x2b   :  { %v94_v24 = vld [vmem:[%s598_s6] sm:$0xf]  ;;  %s524_s6 = smov [#allocation8]  }
  0x2c   :  { %371 = vmatpush3.bf16.msra.mxu0 %v415_v3  ;;  %381 = vmatpush3.bf16.msra.mxu1 %v419_v6  ;;  %v344_v26 = vld [vmem:[%s596_s4] ss:$0 sm:$0xff]  ;;  %s328_s22 = sshll.u32 %s524_s6, 4  ;;  %s329_s22 = int_to_ptr.vmem [resolvable:$true] %s328_s22 }
  0x2d   :  { %372 = vmatprep.subr.bf16.mxu0 %v521_v0  ;;  %382 = vmatprep.subr.bf16.mxu1 %v521_v0  ;;  %v93_v36 = vld [vmem:[%s597_s5] sm:$0x3]  ;;  %s490_s4 = scalar_lea.vmem %s329_s22, 64  ;;  %p495_p2 = scmp.lt.s32.totalorder %s329_s22, %s329_s22 }
  0x2e   :  { %277 = vperm.xlu0 %413, %v94_v24   ;;  %p491_p1 = scmp.ne.s32.totalorder %s329_s22, %s490_s4  ;;  %p496_p3 = scmp.lt.s32.totalorder %s490_s4, %s490_s4 }
  0x30   :  { %373 = vmatpush3.bf16.msra.mxu0 %v416_v5  ;;  %383 = vmatpush3.bf16.msra.mxu1 %v420_v8  ;;  %p497_p4 = por %p496_p3, %p495_p2 }
  0x31   :  { %398 = vmatprep.subr.bf16.mxu0 %v521_v0  ;;  %384 = vmatprep.subr.bf16.mxu1 %v521_v0 }
  0x32   :  { %p498_p5 = pnand %p497_p4, %p491_p1 }
  0x33   :  { %375 = vmatmul.mubr.msk.bf16.vlgmr.msra.gmra.mxu0 %vm125_vm2, %v417_v7 }
  0x34   :  { %400 = vmatprep.mubr.msk.bf16.mxu0 %vm522_vm0, %v521_v0  ;;  %385 = vmatpush3.bf16.msra.mxu1 %v421_v9 }
  0x35   :  { %386 = vmatprep.subr.bf16.mxu1 %v521_v0 }
  0x38   :  { %387 = vmatpush3.bf16.msra.mxu1 %v422_v10 }
  0x39   :  { %388 = vmatprep.subr.bf16.mxu1 %v521_v0 }
  0x3c   :  { %389 = vmatpush3.bf16.msra.mxu1 %v423_v11 }
  0x3d   :  { %390 = vmatprep.subr.bf16.mxu1 %v521_v0 }
  0x40   :  { %391 = vmatpush3.bf16.msra.mxu1 %v424_v12 }
  0x41   :  { %392 = vmatprep.subr.bf16.mxu1 %v521_v0 }
  0x44   :  { %393 = vmatpush3.bf16.msra.mxu1 %v425_v13 }
  0xa9   :  { %v278_v37 = vpop.permute.xlu0 %277 }
  0xf3   :  { %v167_v15 = vpop.f32.mrf.mxu0 }
  0xf4   :  { %v168_v16 = vadd.f32 %v338_v14, %v167_v15 }
  0xf5   :  { %v376_v17 = vpop.f32.mrf.mxu0 }
  0xf6   :  { %426 = vtanh.f32 %v168_v16 }
  0xf7   :  { %v170_v18 = vpop.f32.mrf.mxu0 }
  0xf8   :  { %v171_v19 = vadd.f32 %v338_v14, %v170_v18 }
  0xf9   :  { %v377_v20 = vpop.f32.mrf.mxu0 }
  0xfa   :  { %428 = vtanh.f32 %v171_v19 }
 0x103   :  { %v427_v21 = vpop.eup %426 }
 0x107   :  { %v429_v22 = vpop.eup %428 }
 0x108   :  { %v176_v23 = vpack.c.bf16 %v429_v22, %v427_v21 }
 0x10a   :  { %395 = vmatmul.mubr.bf16.vlgmr.msra.gmra.mxu1 %v176_v23 }
 0x1ca   :  { %v265_v27 = vpop.f32.mrf.mxu1 }
 0x1cb   :  { %v266_v29 = vadd.f32 %v344_v26, %v265_v27 }
 0x1cc   :  { %v396_v28 = vpop.f32.mrf.mxu1 }
 0x1cd   :  { %v272_v33 = vmax.f32 %v266_v29, 0.0 }
 0x1ce   :  { %v268_v30 = vpop.f32.mrf.mxu1 }
 0x1cf   :  { %v269_v31 = vadd.f32 %v344_v26, %v268_v30 }
 0x1d0   :  { %v397_v32 = vpop.f32.mrf.mxu1 }
 0x1d1   :  { %v273_v34 = vmax.f32 %v269_v31, 0.0 }
 0x1d3   :  { %v274_v35 = vpack.c.bf16 %v273_v34, %v272_v33 }
 0x1d5   :  { %399 = vmatpush3.bf16.xpose.msra.mxu0 %v274_v35 }
 0x1dc   :  { %401 = vmatmul.mubr.bf16.vlgmr.msra.gmra.mxu0 %v93_v36 }
 0x29c   :  { %v314_v38 = vpop.f32.mrf.mxu0 }
 0x29d   :  { %v315_v39 = vadd.f32 %v314_v38, %v278_v37 }
 0x29e   :  { %v402_v40 = vpop.f32.mrf.mxu0 }
 0x29f   :  { %321 = vst.msk [vmem:[#allocation8] sm:$0xf] %vm320_vm3, %v315_v39 }
 0x2a0   :  { %v317_v41 = vpop.f32.mrf.mxu0 }
 0x2a1   :  { %501 = shalt.err (!%p498_p5)
}
 0x2a2   :  { %331 = dma.vmem_to_hbm [thread:$0]  %s329_s22, 64, %s599_s7, [#allocation4]   ;;  %v403_v42 = vpop.f32.mrf.mxu0 }
 0x2a3   :  { %514 = dma.done.wait [#allocation4], 64  }
 0x2a4   :  { %515 = vsyncadd [#allocation4], 4294967232 }
 0x2a5   :  { %335 = vsyncpa [#allocation3], 1 }
 0x2a6   :  { %336 = vsyncpa [#allocation6], 1 }
 0x2a7   :  { %337 = vsyncpa [#allocation4], 1 }

</bundles_post_ra>
